<compile_context>
chip_gen: v7x
topology: tpu7x:2x2x1
jax: 0.10.0
libtpu: 0.0.40
codegen_flags: <defaults>
</compile_context>

<pallas_src>
import functools

import jax
import jax.numpy as jnp
from jax.experimental import pallas as pl
from jax.experimental.pallas import tpu as pltpu


def _round_up(x: int, m: int) -> int:
    return ((x + m - 1) // m) * m


def _pick_tm(M: int, tm_max: int) -> int:
    """Pick the M tile.

    Wants: (a) exact divisor of M (no padding, no ragged last block, no output
    slice copy), (b) multiple of 16 (bf16 packs 16 rows per vreg sublane tile),
    (c) >= 2 grid blocks when M >= 32 so the "parallel" axis can be sharded
    across 2 TensorCores (v7x) / megacore, (d) as large as possible up to
    tm_max to amortize per-grid-step pipeline overhead.
    """
    cap = min(tm_max, M if M < 32 else M // 2)
    for step in (16, 8):
        lim = (cap // step) * step
        for tm in range(lim, 0, -step):
            if M % tm == 0:
                return tm
    # Odd/tiny M with no 8-multiple divisor: one full block (a block dim equal
    # to the full array dim is always legal).
    return M


def _proj_kernel(x_ref, w_ref, b_ref, o_ref):
    # (tm, Kp) @ (Kp, Np) with f32 accumulation on the MXU; bias add in f32;
    # downcast only on the final store.
    acc = jnp.dot(x_ref[...], w_ref[...], preferred_element_type=jnp.float32)
    o_ref[...] = (acc + b_ref[...]).astype(o_ref.dtype)


def tubelet_projection(patches, w_kn, bias, *, out_dtype=jnp.bfloat16, tm_max=1024):
    """patches: (M, K), w_kn: (K, N), bias: (N,) f32 -> (M, N) out_dtype."""
    M, K = patches.shape
    N = w_kn.shape[1]

    # Lane/MXU-friendly padding of K and N (no-op for real ViViT: K=1536, N=768).
    Kp = _round_up(K, 128)
    Np = _round_up(N, 128)
    if Kp != K:
        patches = jnp.pad(patches, ((0, 0), (0, Kp - K)))
        w_kn = jnp.pad(w_kn, ((0, Kp - K), (0, 0)))
    if Np != N:
        w_kn = jnp.pad(w_kn, ((0, 0), (0, Np - N)))
        bias = jnp.pad(bias, (0, Np - N))

    tm = _pick_tm(M, tm_max)
    bias2d = bias.astype(jnp.float32).reshape(1, Np)

    def _resident_spec(shape):
        # Constant index map -> DMA'd once, stays resident across the grid.
        # Buffered(1) drops the pointless second buffer (matters on v7x 64 MiB).
        try:
            return pl.BlockSpec(shape, lambda i: (0, 0), pipeline_mode=pl.Buffered(1))
        except (TypeError, AttributeError):  # older JAX without pipeline_mode
            return pl.BlockSpec(shape, lambda i: (0, 0))

    # Measured VMEM budget (double-buffered streaming blocks, weight budgeted
    # at 2x in case the single-buffer hint is unavailable) + slack for Mosaic
    # internal scratch.  Leaves headroom on v7x's 64 MiB/TC.
    in_item = jnp.dtype(patches.dtype).itemsize
    out_item = jnp.dtype(out_dtype).itemsize
    w_item = jnp.dtype(w_kn.dtype).itemsize
    vmem_bytes = (2 * tm * Kp * in_item        # patches blocks (double-buffered)
                  + 2 * tm * Np * out_item     # output blocks (double-buffered)
                  + 2 * Kp * Np * w_item       # resident weight (budget 2x)
                  + 8 * Np * 4)                # bias, padded to a sublane tile
    vmem_limit = min(int(vmem_bytes * 1.5) + (4 << 20), 48 << 20)

    out = pl.pallas_call(
        _proj_kernel,
        out_shape=jax.ShapeDtypeStruct((M, Np), out_dtype),
        grid=(M // tm,),
        in_specs=[
            pl.BlockSpec((tm, Kp), lambda i: (i, 0)),
            _resident_spec((Kp, Np)),          # weight, resident
            _resident_spec((1, Np)),           # bias, resident
        ],
        out_specs=pl.BlockSpec((tm, Np), lambda i: (i, 0)),
        compiler_params=pltpu.CompilerParams(
            dimension_semantics=("parallel",),
            vmem_limit_bytes=vmem_limit,
        ),
    )(patches, w_kn, bias2d)

    return out if Np == N else out[:, :N]


@functools.partial(jax.jit,
                   static_argnames=("tubelet_size", "out_dtype", "compute_dtype"))
def vivit_tubelet_embeddings(pixel_values, weight, bias, tubelet_size,
                             out_dtype=jnp.bfloat16,
                             compute_dtype=jnp.bfloat16):
    """
    pixel_values: (B, T, C, H, W) float32
    weight:       (hidden, C, tt, ph, pw) float32  (PyTorch Conv3d layout)
    bias:         (hidden,) float32
    returns:      (B, seq_len, hidden) in `out_dtype`
    Set out_dtype/compute_dtype to float32 for bit-closer parity with PyTorch.
    """
    B, T, C, H, W = pixel_values.shape
    tt, ph, pw = tubelet_size
    hidden = weight.shape[0]
    Tp, Hp, Wp = T // tt, H // ph, W // pw
    seq_len = Tp * Hp * Wp
    K = C * tt * ph * pw

    # Unfold into tubelets, flattening K in (c, dt, dh, dw) order to match
    # weight.reshape(hidden, -1); seq ordering (t', h', w') matches Conv3d
    # output flatten(2).  The downcast is fused with the transpose so the one
    # materialized HBM copy of the video is half-size.
    x = pixel_values.reshape(B, Tp, tt, C, Hp, ph, Wp, pw).astype(compute_dtype)
    x = jnp.transpose(x, (0, 1, 4, 6, 3, 2, 5, 7))      # (B,T',H',W',C,tt,ph,pw)
    patches = x.reshape(B * seq_len, K)

    w_kn = jnp.transpose(weight.reshape(hidden, K)).astype(compute_dtype)  # (K, N)

    out = tubelet_projection(patches, w_kn, bias.astype(jnp.float32),
                             out_dtype=out_dtype)
    return out.reshape(B, seq_len, hidden)


if __name__ == "__main__":
    # Small config consistent with the module:
    #   num_frames=4, num_channels=3, image_size=16,
    #   tubelet_size=(2,4,4), hidden_size=32
    B, T, C, H, W = 2, 4, 3, 16, 16
    tubelet = (2, 4, 4)
    hidden = 32

    key = jax.random.PRNGKey(0)
    k_x, k_w, k_b = jax.random.split(key, 3)
    pixel_values = jax.random.normal(k_x, (B, T, C, H, W), dtype=jnp.float32)
    weight = jax.random.normal(k_w, (hidden, C) + tubelet, dtype=jnp.float32) * 0.02
    bias = jax.random.normal(k_b, (hidden,), dtype=jnp.float32) * 0.02

    out = vivit_tubelet_embeddings(pixel_values, weight, bias, tubelet)
    out = jax.block_until_ready(out)

    # Reference via lax 3-D convolution (NCDHW / OIDHW), same math as PyTorch Conv3d.
    x_ncthw = jnp.transpose(pixel_values, (0, 2, 1, 3, 4))  # (B, C, T, H, W)
    conv = jax.lax.conv_general_dilated(
        x_ncthw, weight, window_strides=tubelet, padding="VALID",
        dimension_numbers=("NCDHW", "OIDHW", "NCDHW"))
    conv = conv + bias.reshape(1, hidden, 1, 1, 1)
    ref = jnp.transpose(conv.reshape(B, hidden, -1), (0, 2, 1))  # (B, seq, hidden)

    seq_len = (T // tubelet[0]) * (H // tubelet[1]) * (W // tubelet[2])
    assert out.shape == (B, seq_len, hidden)
    # bf16 operands and bf16 output (f32 accumulation) vs f32 reference.
    assert jnp.allclose(out.astype(jnp.float32), ref, atol=2e-2, rtol=2e-2)
    print("KERNEL_OK")
</pallas_src>

<mosaic_0001>
module attributes {stable_mosaic.version = 11 : i64} {
  func.func @_proj_kernel(%arg0: i32, %arg1: memref<32x128xbf16, #tpu.memory_space<vmem>>, %arg2: memref<128x128xbf16, #tpu.memory_space<vmem>>, %arg3: memref<1x128xf32, #tpu.memory_space<vmem>>, %arg4: memref<32x128xbf16, #tpu.memory_space<vmem>>) attributes {dimension_semantics = [#tpu.dimension_semantics<parallel>], iteration_bounds = array<i64: 2>, scalar_prefetch = 0 : i64, scratch_operands = 0 : i64, tpu.core_type = #tpu.core_type<tc>, window_params = [{transform_indices = @transform_0, window_bounds = array<i64: 32, 128>}, {pipeline_mode = #tpu.pipeline_mode<synchronous>, transform_indices = @transform_1, window_bounds = array<i64: 128, 128>}, {pipeline_mode = #tpu.pipeline_mode<synchronous>, transform_indices = @transform_2, window_bounds = array<i64: 1, 128>}, {transform_indices = @transform_3, window_bounds = array<i64: 32, 128>}]} {
    %c0 = arith.constant 0 : index
    %c0_0 = arith.constant 0 : index
    %0 = vector.load %arg1[%c0, %c0_0] : memref<32x128xbf16, #tpu.memory_space<vmem>>, vector<32x128xbf16>
    %c0_1 = arith.constant 0 : index
    %c0_2 = arith.constant 0 : index
    %1 = vector.load %arg2[%c0_1, %c0_2] : memref<128x128xbf16, #tpu.memory_space<vmem>>, vector<128x128xbf16>
    %cst = arith.constant dense<0.000000e+00> : vector<32x128xf32>
    %2 = tpu.matmul %0, %1, %cst {dimension_numbers = #tpu.dot_dimension_numbers<[1], [0], [0], [1], [0, 0, 1, 1], [], []>} : vector<32x128xbf16>, vector<128x128xbf16>, vector<32x128xf32> -> vector<32x128xf32>
    %c0_3 = arith.constant 0 : index
    %c0_4 = arith.constant 0 : index
    %3 = vector.load %arg3[%c0_3, %c0_4] : memref<1x128xf32, #tpu.memory_space<vmem>>, vector<1x128xf32>
    %4 = vector.broadcast %3 : vector<1x128xf32> to vector<32x128xf32>
    %5 = arith.addf %2, %4 : vector<32x128xf32>
    %6 = arith.truncf %5 : vector<32x128xf32> to vector<32x128xbf16>
    %c0_5 = arith.constant 0 : index
    %c0_6 = arith.constant 0 : index
    %7 = vector.load %arg4[%c0_5, %c0_6] : memref<32x128xbf16, #tpu.memory_space<vmem>>, vector<32x128xbf16>
    tpu.vector_store %arg4[%c0_5, %c0_6], %6 {strides = array<i32>} : memref<32x128xbf16, #tpu.memory_space<vmem>>, vector<32x128xbf16>,
    return
  }
  func.func @transform_0(%arg0: i32) -> (i32, i32) {
    %c0_i32 = arith.constant 0 : i32
    %c0_i32_0 = arith.constant 0 : i32
    return %arg0, %c0_i32 : i32, i32
  }
  func.func @transform_1(%arg0: i32) -> (i32, i32) {
    %c0_i32 = arith.constant 0 : i32
    %c0_i32_0 = arith.constant 0 : i32
    %c0_i32_1 = arith.constant 0 : i32
    return %c0_i32, %c0_i32_0 : i32, i32
  }
  func.func @transform_2(%arg0: i32) -> (i32, i32) {
    %c0_i32 = arith.constant 0 : i32
    %c0_i32_0 = arith.constant 0 : i32
    %c0_i32_1 = arith.constant 0 : i32
    return %c0_i32, %c0_i32_0 : i32, i32
  }
  func.func @transform_3(%arg0: i32) -> (i32, i32) {
    %c0_i32 = arith.constant 0 : i32
    %c0_i32_0 = arith.constant 0 : i32
    return %arg0, %c0_i32 : i32, i32
  }
}

</mosaic_0001>

<bundles_post_ra>
// kernel: vivit_tubelet_embeddings.1
= control target key start
LH: loop header
LB: loop body
LE: loop exit
PB: predicated region body
PF: predicated region fallthrough
CT: control target
= control target key end

     0   :  { %8 = vsyncpa [#allocation3], 0  ;;  %s745_s0 = inlined_call_operand.vmem [shape: bf16[64,128], index: 0, kind: input, shape index: {}]   ;;  %s746_s1 = inlined_call_operand.vmem [shape: bf16[128,128], index: 1, kind: input, shape index: {}]   ;;  %s747_s2 = inlined_call_operand.vmem [shape: f32[1,128], index: 2, kind: input, shape index: {}]   ;;  %s748_s3 = inlined_call_operand.hbm [shape: bf16[64,128], index: 3, kind: output, shape index: {}]  }
   0x1   :  { %10 = vsyncpa [#allocation3 + $0x1], 0  ;;  %s616_s12 = smov 0   ;;  %s618_s13 = smov 0  }
   0x2   :  { %s620_s14 = smov 0   ;;  %s622_s15 = smov 0  }
   0x3 LB: > { %s637_s16 = sadd.s32 4294967295, %s591_s15   ;;  %s405_s17 = sadd.s32 4294967294, %s591_s15   ;;  %s591_s15 = sphi %s622_s15, %s754_s15   ;;  %s587_s14 = sphi %s620_s14, %s753_s14   ;;  %s583_s13 = sphi %s618_s13, %s752_s13   ;;  %s579_s12 = sphi %s616_s12, %s751_s12  }
   0x4   : > { %s641_s18 = sadd.s32 1, %s591_s15   ;;  %s91_s19 = sadd.s32 1, %s587_s14 }
   0x5   : > { %s88_s20 = ssub.s32 %s591_s15, %s641_s18  ;;  %p101_p0 = scmp.ne.s32.totalorder %s587_s14, %s583_s13 }
   0x6   : > { %p89_p1 = scmp.eq.s32.totalorder %s88_s20, 0  ;;  %p102_p2 = scmp.eq.s32.totalorder %s637_s16, 1 }
   0x7   : > { %p107_p3 = scmp.ne.s32.totalorder %s583_s13, %s579_s12  ;;  %p108_p4 = scmp.eq.s32.totalorder %s405_s17, 1 }
   0x8   : > { %s652_s21 = scalar_select %p89_p1, %s587_s14, %s91_s19  }
   0x9   : > { %p654_p5 = por %p102_p2, %p101_p0  ;;  %p658_p6 = por %p108_p4, %p107_p3 }
   0xa   : > { %p408_p7 = scmp.ge.s32.totalorder %s591_s15, 1  ;;  %p141_p8 = scmp.lt.s32.totalorder %s591_s15, 3 }
   0xc   : > { %p142_p9 = pnand %p408_p7, %p141_p8 }
   0xd   : > { %v519_v0 = vld [vmem:[%s746_s1] sm:$0xff] (!%p142_p9)   ;;  %s410_s26 = sshll.u32 (!%p142_p9), %s637_s16, 2  ;;  %v520_v1 = vld [vmem:[%s746_s1 + $0x8] sm:$0xff] (!%p142_p9)   ;;  %v521_v2 = vld [vmem:[%s746_s1 + $0x10] sm:$0xff] (!%p142_p9)   ;;  %s162_s27 = sand.u32 (!%p142_p9), 1, %s583_s13  }
   0xe   : > { %145 = sbr.rel (%p142_p9) target bundleno = 280 (0x118), region = 32  ;;  %p166_p10 = scmp.lt.s32.totalorder (!%p142_p9), %s410_s26, 7  ;;  %458 = vmatprep.subr.bf16.mxu0 (!%p142_p9), %v519_v0  ;;  %v522_v3 = vld [vmem:[%s746_s1 + $0x18] sm:$0xff] (!%p142_p9)   ;;  %v523_v5 = vld [vmem:[%s746_s1 + $0x20] sm:$0xff] (!%p142_p9)   ;;  %v524_v6 = vld [vmem:[%s746_s1 + $0x28] sm:$0xff] (!%p142_p9)  }
   0xf   : > { %459 = vmatpush3.bf16.msra.mxu0 (!%p142_p9), %v519_v0  ;;  %v525_v7 = vld [vmem:[%s746_s1 + $0x30] sm:$0xff] (!%p142_p9)   ;;  %v526_v8 = vld [vmem:[%s746_s1 + $0x38] sm:$0xff] (!%p142_p9)   ;;  %s409_s28 = sshll.u32 (!%p142_p9), %s162_s27, 4  ;;  %v412_v11 = vld [vmem:[%s747_s2] ss:$0 sm:$0xff] (!%p142_p9)  ;;  %s436_s6 = sshll.u32 (!%p142_p9), %s637_s16, 8 }
  0x10   : > { %460 = vmatprep.subr.bf16.mxu0 (!%p142_p9), %v520_v1  ;;  %s702_s9 = scalar_lea.hbm (!%p142_p9), %s748_s3, %s436_s6  ;;  %s704_s16 = scalar_lea.sflag (!%p142_p9), [#allocation3], %s162_s27 }
  0x11   : > { %s593_s11 = smov (!%p142_p9), [#allocation2]  }
  0x12   : > { %s533_s17 = sshll.u32 (!%p142_p9), %s593_s11, 4  ;;  %s534_s17 = int_to_ptr.vmem [resolvable:$false] %s533_s17 }
  0x13   : > { %461 = vmatpush3.bf16.msra.mxu0 (!%p142_p9), %v520_v1  ;;  %s535_s19 = scalar_lea.vmem (!%p142_p9), %s534_s17, 512 }
  0x14   : > { %462 = vmatprep.subr.bf16.mxu0 (!%p142_p9), %v521_v2 }
  0x15   : > { %s756_s26 = smov (!%p166_p10, %s410_s26), 7 }
  0x16   : > { %s411_s4 = sshll.u32 %s756_s26, 2 }
  0x17   : > { %s169_s7 = scalar_lea.vmem %s745_s0, %s411_s4  ;;  %463 = vmatpush3.bf16.msra.mxu0 %v521_v2  ;;  %s164_s4 = scalar_lea.vmem [#allocation2], %s409_s28 }
  0x18   : > { %v527_v4 = vld [vmem:[%s169_s7] sm:$0xff]   ;;  %464 = vmatprep.subr.bf16.mxu0 %v522_v3  ;;  %v528_v9 = vld [vmem:[%s169_s7 + $0x8] sm:$0xff]   ;;  %s343_s5 = sshll.u32 %s164_s4, 4  ;;  %s697_s5 = int_to_ptr.vmem [resolvable:$true] %s343_s5 }
  0x19   : > { %474 = vmatprep.mubr.bf16.mxu0 %v527_v4  ;;  %s529_s10 = scalar_lea.vmem %s697_s5, 256  ;;  %p536_p0 = scmp.lt.s32.totalorder %s697_s5, %s534_s17 }
  0x1a   : > { %p530_p11 = scmp.ne.s32.totalorder %s697_s5, %s529_s10  ;;  %p537_p1 = scmp.lt.s32.totalorder %s535_s19, %s529_s10 }
  0x1b   : > { %465 = vmatpush3.bf16.msra.mxu0 %v522_v3 }
  0x1c   : > { %466 = vmatprep.subr.bf16.mxu0 %v523_v5  ;;  %p531_p12 = pnand %p530_p11, %p654_p5  ;;  %p538_p2 = por %p537_p1, %p536_p0 }
  0x1e   : > { %p532_p13 = pneg %p531_p12 }
  0x1f   : > { %467 = vmatpush3.bf16.msra.mxu0 %v523_v5 }
  0x20   : > { %468 = vmatprep.subr.bf16.mxu0 %v524_v6  ;;  %p539_p3 = pnand %p538_p2, %p532_p13 }
  0x23   : > { %469 = vmatpush3.bf16.msra.mxu0 %v524_v6 }
  0x24   : > { %470 = vmatprep.subr.bf16.mxu0 %v525_v7 }
  0x27   : > { %471 = vmatpush3.bf16.msra.mxu0 %v525_v7 }
  0x28   : > { %472 = vmatprep.subr.bf16.mxu0 %v526_v8 }
  0x2b   : > { %473 = vmatpush3.bf16.msra.mxu0 %v526_v8 }
  0x2e   : > { %475 = vmatmul.mubr.bf16.vlgmr.msra.gmra.mrb[0].mxu0 %v528_v9 }
 0x101   : > { %v476_v10 = vpop.f32.mrb[0].mxu0 }
 0x102   : > { %v294_v12 = vpop.f32.mrb[1].mxu0  ;;  %v303_v14 = vadd.f32 %v476_v10, %v412_v11 }
 0x103   : > { %v477_v13 = vpop.f32.mrb[2].mxu0  ;;  %v295_v17 = vadd.f32 %v412_v11, %v294_v12 }
 0x104   : > { %v306_v15 = vadd.f32 %v477_v13, %v412_v11  ;;  %v297_v16 = vpop.f32.mrb[3].mxu0 }
 0x105   : > { %v298_v18 = vadd.f32 %v412_v11, %v297_v16 }
 0x106   : > { %v445_v19 = vpack.c.bf16 %v306_v15, %v303_v14 }
 0x107   : > { %v440_v20 = vpack.c.bf16 %v298_v18, %v295_v17 }
 0x108   : > { %447 = vst [vmem:[%s164_s4 + $0x8] sm:$0xff] %v445_v19  }
 0x109   : > { %441 = vst [vmem:[%s164_s4] sm:$0xff] %v440_v20  }
 0x10a   : > { %542 = shalt.err (!%p539_p3)
}
 0x10b   : > { %s543_s20 = scalar_lea.hbm %s702_s9, 256  ;;  %s547_s26 = scalar_lea.hbm %s748_s3, 512 }
 0x10c   : > { %p544_p4 = scmp.ne.s32.totalorder %s702_s9, %s543_s20  ;;  %p548_p9 = scmp.lt.u32.totalorder %s702_s9, %s748_s3 }
 0x10d   : > { %p549_p10 = scmp.lt.u32.totalorder %s547_s26, %s543_s20  ;;  %p551_p12 = scmp.lt.u32.totalorder %s543_s20, %s702_s9 }
 0x10e   : > { %p545_p7 = pnand %p544_p4, %p654_p5 }
 0x10f   : > { %p550_p11 = por %p549_p10, %p548_p9 }
 0x110   : > { %p546_p8 = pneg %p545_p7 }
 0x111   : > { %p552_p13 = por %p551_p12, %p550_p11 }
 0x113   : > { %p553_p0 = pnand %p552_p13, %p546_p8 }
 0x115   : > { %556 = shalt.err (!%p553_p0)
}
 0x116   : > { %s594_s29 = smov 64   ;;  %s595_s30 = smov 4  }
 0x117   : > { %478 = dma.vmem_to_hbm [thread:$0]  (%p654_p5), %s697_s5, 256, %s702_s9, %s704_s16, %s594_s29, %s594_s29, %s595_s30  }
 0x118 PF: > { %p484_p1 = scmp.ge.s32.totalorder %s591_s15, 2  ;;  %s358_s4 = sand.u32 1, %s579_s12  }
 0x119   : > { %s359_s6 = scalar_lea.sflag [#allocation3], %s358_s4 }
 0x11a   : > { %p481_p2 = pnand %p484_p1, %p658_p6 }
 0x11c   : > { %574 = dma.done.wait (!%p481_p2), %s359_s6, 256  }
 0x11d   : > { %576 = vsyncadd (!%p481_p2), %s359_s6, 4294967040  ;;  %p13_p3 = scmp.ge.s32.totalorder %s641_s18, 4   ;;  %s751_s12 = smov %s583_s13 }
 0x11e   : > { %s752_s13 = smov %s587_s14  ;;  %s753_s14 = smov %s652_s21 }
 0x11f   : > { %s754_s15 = smov %s641_s18  ;;  %15 = sbr.rel (!%p13_p3) target bundleno = 3 (0x3), region = 67 }
 0x126   :  { %364 = vsyncpa [#allocation3], 1 }
 0x127   :  { %366 = vsyncpa [#allocation3 + $0x1], 1 }

</bundles_post_ra>
